<compile_context>
chip_gen: v5e
topology: v5e:2x2
jax: 0.10.0
libtpu: 0.0.40
codegen_flags: <defaults>
</compile_context>

<pallas_src>
import functools

import jax
import jax.numpy as jnp
from jax.experimental import pallas as pl
from jax.experimental.pallas import tpu as pltpu


def _bce_tile_kernel(x_ref, m_ref, pos_ref, neg_ref, acc_ref, *, n_rows, tile_n):
    i = pl.program_id(0)

    @pl.when(i == 0)
    def _():
        acc_ref[0] = 0.0   # running sum of positive-masked losses
        acc_ref[1] = 0.0   # running sum of negative-masked losses
        acc_ref[2] = 0.0   # running count of (mask == 0) elements

    # Cast AFTER the (possibly narrow-dtype) tile is resident in VMEM.
    x = x_ref[...].astype(jnp.float32)
    m = m_ref[...].astype(jnp.float32)

    is_pos = m == 1.0
    is_neg = m == 0.0
    pos_id = is_pos.astype(jnp.float32)
    neg_id = is_neg.astype(jnp.float32)

    # Single-log rewrite: for mask==1 only -log(x+eps) survives, for mask==0
    # only -log(1-x+eps); any other mask value is zeroed by pos_id/neg_id.
    z = jnp.where(is_pos, x, 1.0 - x)

    if n_rows % tile_n != 0:
        # Tail tile: rows >= n_rows are out-of-bounds padding.  Zero their
        # selectors and force a safe log argument so NaNs cannot leak in.
        row = i * tile_n + jax.lax.broadcasted_iota(jnp.int32, x.shape, 0)
        valid = row < n_rows
        pos_id = jnp.where(valid, pos_id, 0.0)
        neg_id = jnp.where(valid, neg_id, 0.0)
        z = jnp.where(valid, z, 1.0)

    neg_log = -jnp.log(z + 1e-14)

    acc_ref[0] += jnp.sum(pos_id * neg_log)
    acc_ref[1] += jnp.sum(neg_id * neg_log)
    acc_ref[2] += jnp.sum(neg_id)

    @pl.when(i == pl.num_programs(0) - 1)
    def _():
        inv_n = jnp.float32(1.0 / n_rows)        # mean(sum(.,1)) == total / N
        pos_ref[0] = acc_ref[0] * inv_n
        # int(neg_id.sum()) truncates toward zero; count >= 0 so floor == trunc.
        # Like the PyTorch reference, this is inf/NaN if the mask has no zeros.
        neg_ref[0] = acc_ref[1] * inv_n / jnp.floor(acc_ref[2])


def bce_loss(inputs, targets, mask, reduction="mean", tile_n=512):
    """Pallas equivalent of BCELoss.forward (reduction='mean').

    `inputs` and `mask` may be any float/int dtype; they are cast to f32
    inside the kernel (saves HBM bytes for bf16 inputs / narrow masks).
    """
    del targets  # unused by the reference forward pass
    assert reduction == "mean", "only the default 'mean' reduction is implemented"
    N, D = inputs.shape
    assert mask.shape == (N, D)

    if N <= tile_n:
        tile_n = N                            # single full block, any N legal
    else:
        tile_n = max(8, (tile_n // 8) * 8)    # sublane-aligned row tile

    grid = (pl.cdiv(N, tile_n),)
    kernel = functools.partial(_bce_tile_kernel, n_rows=N, tile_n=tile_n)

    pos, neg = pl.pallas_call(
        kernel,
        grid=grid,
        in_specs=[
            pl.BlockSpec((tile_n, D), lambda i: (i, 0)),
            pl.BlockSpec((tile_n, D), lambda i: (i, 0)),
        ],
        out_specs=(
            pl.BlockSpec(memory_space=pltpu.SMEM),
            pl.BlockSpec(memory_space=pltpu.SMEM),
        ),
        out_shape=(
            jax.ShapeDtypeStruct((1,), jnp.float32),
            jax.ShapeDtypeStruct((1,), jnp.float32),
        ),
        scratch_shapes=[pltpu.SMEM((3,), jnp.float32)],
        compiler_params=pltpu.CompilerParams(
            dimension_semantics=("arbitrary",)),
    )(inputs, mask)

    return pos[0], neg[0]


def bce_loss_ref(inputs, targets, mask):
    """Pure-JAX reference mirroring the PyTorch module exactly."""
    del targets
    inputs = inputs.astype(jnp.float32)
    mask = mask.astype(jnp.float32)
    pos_id = (mask == 1.0).astype(jnp.float32)
    neg_id = (mask == 0.0).astype(jnp.float32)
    bce = -(mask * jnp.log(inputs + 1e-14)
            + (1.0 - mask) * jnp.log(1.0 - inputs + 1e-14))
    pos = jnp.mean(jnp.sum(pos_id * bce, axis=1))
    neg = jnp.mean(jnp.sum(neg_id * bce, axis=1)) / jnp.floor(jnp.sum(neg_id))
    return pos, neg


def _close(a, b, rtol=1e-4, atol=1e-5):
    a, b = float(a), float(b)
    return abs(a - b) <= atol + rtol * abs(b)


if __name__ == "__main__":
    key = jax.random.PRNGKey(0)
    k1, k2, k3, k4, k5 = jax.random.split(key, 5)

    # --- test 1: small, single-tile (one vreg per operand) -------------------
    N1, D1 = 8, 128
    x1 = jax.nn.sigmoid(jax.random.normal(k1, (N1, D1), jnp.float32))   # in (0, 1)
    t1 = jax.random.bernoulli(k2, 0.5, (N1, D1)).astype(jnp.float32)    # unused
    m1 = jax.random.bernoulli(k3, 0.5, (N1, D1)).astype(jnp.float32)    # {0.0, 1.0}

    pos1, neg1 = bce_loss(x1, t1, m1)
    jax.block_until_ready((pos1, neg1))
    pr1, nr1 = bce_loss_ref(x1, t1, m1)
    assert _close(pos1, pr1), (float(pos1), float(pr1))
    assert _close(neg1, nr1), (float(neg1), float(nr1))

    # --- test 2: multi-tile grid with a ragged tail (exercises accumulators) -
    N2, D2 = 40, 128
    x2 = jax.nn.sigmoid(jax.random.normal(k4, (N2, D2), jnp.float32))
    m2 = jax.random.bernoulli(k5, 0.5, (N2, D2)).astype(jnp.float32)

    pos2, neg2 = bce_loss(x2, x2, m2, tile_n=16)   # grid=(3,), last tile padded
    jax.block_until_ready((pos2, neg2))
    pr2, nr2 = bce_loss_ref(x2, x2, m2)
    assert _close(pos2, pr2), (float(pos2), float(pr2))
    assert _close(neg2, nr2), (float(neg2), float(nr2))

    print("KERNEL_OK")
</pallas_src>

<mosaic_0001>
module attributes {stable_mosaic.version = 11 : i64} {
  func.func @_bce_tile_kernel(%arg0: i32, %arg1: memref<8x128xf32, #tpu.memory_space<vmem>>, %arg2: memref<8x128xf32, #tpu.memory_space<vmem>>, %arg3: memref<1xf32, #tpu.memory_space<smem>>, %arg4: memref<1xf32, #tpu.memory_space<smem>>, %arg5: memref<3xf32, #tpu.memory_space<smem>>) attributes {dimension_semantics = [#tpu.dimension_semantics<arbitrary>], iteration_bounds = array<i64: 1>, scalar_prefetch = 0 : i64, scratch_operands = 1 : i64, tpu.core_type = #tpu.core_type<tc>, window_params = [{transform_indices = @transform_0, window_bounds = array<i64: 8, 128>}, {transform_indices = @transform_1, window_bounds = array<i64: 8, 128>}, {transform_indices = @transform_2, window_bounds = array<i64: 1>}, {transform_indices = @transform_3, window_bounds = array<i64: 1>}]} {
    %c0_i32 = arith.constant 0 : i32
    %0 = arith.cmpi eq, %arg0, %c0_i32 : i32
    %1 = arith.extui %0 : i1 to i32
    %c0_i32_0 = arith.constant 0 : i32
    %2 = arith.cmpi ne, %1, %c0_i32_0 : i32
    scf.if %2 {
      %cst_17 = arith.constant 0.000000e+00 : f32
      %c0_18 = arith.constant 0 : index
      %47 = memref.load %arg5[%c0_18] : memref<3xf32, #tpu.memory_space<smem>>
      memref.store %cst_17, %arg5[%c0_18] : memref<3xf32, #tpu.memory_space<smem>>
      %cst_19 = arith.constant 0.000000e+00 : f32
      %c1_20 = arith.constant 1 : index
      %48 = memref.load %arg5[%c1_20] : memref<3xf32, #tpu.memory_space<smem>>
      memref.store %cst_19, %arg5[%c1_20] : memref<3xf32, #tpu.memory_space<smem>>
      %cst_21 = arith.constant 0.000000e+00 : f32
      %c2_22 = arith.constant 2 : index
      %49 = memref.load %arg5[%c2_22] : memref<3xf32, #tpu.memory_space<smem>>
      memref.store %cst_21, %arg5[%c2_22] : memref<3xf32, #tpu.memory_space<smem>>
    } else {
    }
    %c0 = arith.constant 0 : index
    %c0_1 = arith.constant 0 : index
    %3 = vector.load %arg1[%c0, %c0_1] : memref<8x128xf32, #tpu.memory_space<vmem>>, vector<8x128xf32>
    %c0_2 = arith.constant 0 : index
    %c0_3 = arith.constant 0 : index
    %4 = vector.load %arg2[%c0_2, %c0_3] : memref<8x128xf32, #tpu.memory_space<vmem>>, vector<8x128xf32>
    %cst = arith.constant 1.000000e+00 : f32
    %5 = vector.broadcast %cst : f32 to vector<8x128xf32>
    %6 = arith.cmpf oeq, %4, %5 : vector<8x128xf32>
    %cst_4 = arith.constant 0.000000e+00 : f32
    %7 = vector.broadcast %cst_4 : f32 to vector<8x128xf32>
    %8 = arith.cmpf oeq, %4, %7 : vector<8x128xf32>
    %9 = arith.extui %6 : vector<8x128xi1> to vector<8x128xi32>
    %10 = arith.sitofp %9 : vector<8x128xi32> to vector<8x128xf32>
    %11 = arith.extui %8 : vector<8x128xi1> to vector<8x128xi32>
    %12 = arith.sitofp %11 : vector<8x128xi32> to vector<8x128xf32>
    %cst_5 = arith.constant 1.000000e+00 : f32
    %13 = vector.broadcast %cst_5 : f32 to vector<8x128xf32>
    %14 = arith.subf %13, %3 : vector<8x128xf32>
    %15 = arith.select %6, %3, %14 : vector<8x128xi1>, vector<8x128xf32>
    %cst_6 = arith.constant 9.99999982E-15 : f32
    %16 = vector.broadcast %cst_6 : f32 to vector<8x128xf32>
    %17 = arith.addf %15, %16 : vector<8x128xf32>
    %18 = math.log %17 : vector<8x128xf32>
    %cst_7 = arith.constant 0.000000e+00 : f32
    %19 = vector.broadcast %cst_7 : f32 to vector<8x128xf32>
    %20 = arith.subf %19, %18 : vector<8x128xf32>
    %c0_8 = arith.constant 0 : index
    %21 = memref.load %arg5[%c0_8] : memref<3xf32, #tpu.memory_space<smem>>
    %22 = arith.mulf %10, %20 : vector<8x128xf32>
    %23 = vector.shape_cast %22 : vector<8x128xf32> to vector<1x8x128xf32>
    %cst_9 = arith.constant dense<0.000000e+00> : vector<1xf32>
    %24 = vector.multi_reduction <add>, %23, %cst_9 [1, 2] : vector<1x8x128xf32> to vector<1xf32>
    %25 = vector.shape_cast %24 : vector<1xf32> to vector<1x1x1xf32>
    %26 = vector.extract %25[0, 0, 0] : f32 from vector<1x1x1xf32>
    %27 = arith.addf %21, %26 : f32
    %c0_10 = arith.constant 0 : index
    %28 = memref.load %arg5[%c0_10] : memref<3xf32, #tpu.memory_space<smem>>
    memref.store %27, %arg5[%c0_10] : memref<3xf32, #tpu.memory_space<smem>>
    %c1 = arith.constant 1 : index
    %29 = memref.load %arg5[%c1] : memref<3xf32, #tpu.memory_space<smem>>
    %30 = arith.mulf %12, %20 : vector<8x128xf32>
    %31 = vector.shape_cast %30 : vector<8x128xf32> to vector<1x8x128xf32>
    %cst_11 = arith.constant dense<0.000000e+00> : vector<1xf32>
    %32 = vector.multi_reduction <add>, %31, %cst_11 [1, 2] : vector<1x8x128xf32> to vector<1xf32>
    %33 = vector.shape_cast %32 : vector<1xf32> to vector<1x1x1xf32>
    %34 = vector.extract %33[0, 0, 0] : f32 from vector<1x1x1xf32>
    %35 = arith.addf %29, %34 : f32
    %c1_12 = arith.constant 1 : index
    %36 = memref.load %arg5[%c1_12] : memref<3xf32, #tpu.memory_space<smem>>
    memref.store %35, %arg5[%c1_12] : memref<3xf32, #tpu.memory_space<smem>>
    %c2 = arith.constant 2 : index
    %37 = memref.load %arg5[%c2] : memref<3xf32, #tpu.memory_space<smem>>
    %38 = vector.shape_cast %12 : vector<8x128xf32> to vector<1x8x128xf32>
    %cst_13 = arith.constant dense<0.000000e+00> : vector<1xf32>
    %39 = vector.multi_reduction <add>, %38, %cst_13 [1, 2] : vector<1x8x128xf32> to vector<1xf32>
    %40 = vector.shape_cast %39 : vector<1xf32> to vector<1x1x1xf32>
    %41 = vector.extract %40[0, 0, 0] : f32 from vector<1x1x1xf32>
    %42 = arith.addf %37, %41 : f32
    %c2_14 = arith.constant 2 : index
    %43 = memref.load %arg5[%c2_14] : memref<3xf32, #tpu.memory_space<smem>>
    memref.store %42, %arg5[%c2_14] : memref<3xf32, #tpu.memory_space<smem>>
    %c0_i32_15 = arith.constant 0 : i32
    %44 = arith.cmpi eq, %arg0, %c0_i32_15 : i32
    %45 = arith.extui %44 : i1 to i32
    %c0_i32_16 = arith.constant 0 : i32
    %46 = arith.cmpi ne, %45, %c0_i32_16 : i32
    scf.if %46 {
      %c0_17 = arith.constant 0 : index
      %47 = memref.load %arg5[%c0_17] : memref<3xf32, #tpu.memory_space<smem>>
      %cst_18 = arith.constant 1.250000e-01 : f32
      %48 = arith.mulf %47, %cst_18 : f32
      %c0_19 = arith.constant 0 : index
      %49 = memref.load %arg3[%c0_19] : memref<1xf32, #tpu.memory_space<smem>>
      memref.store %48, %arg3[%c0_19] : memref<1xf32, #tpu.memory_space<smem>>
      %c1_20 = arith.constant 1 : index
      %50 = memref.load %arg5[%c1_20] : memref<3xf32, #tpu.memory_space<smem>>
      %cst_21 = arith.constant 1.250000e-01 : f32
      %51 = arith.mulf %50, %cst_21 : f32
      %c2_22 = arith.constant 2 : index
      %52 = memref.load %arg5[%c2_22] : memref<3xf32, #tpu.memory_space<smem>>
      %53 = math.floor %52 : f32
      %54 = arith.divf %51, %53 : f32
      %c0_23 = arith.constant 0 : index
      %55 = memref.load %arg4[%c0_23] : memref<1xf32, #tpu.memory_space<smem>>
      memref.store %54, %arg4[%c0_23] : memref<1xf32, #tpu.memory_space<smem>>
    } else {
    }
    return
  }
  func.func @transform_0(%arg0: i32) -> (i32, i32) {
    %c0_i32 = arith.constant 0 : i32
    %c0_i32_0 = arith.constant 0 : i32
    return %arg0, %c0_i32 : i32, i32
  }
  func.func @transform_1(%arg0: i32) -> (i32, i32) {
    %c0_i32 = arith.constant 0 : i32
    %c0_i32_0 = arith.constant 0 : i32
    return %arg0, %c0_i32 : i32, i32
  }
  func.func @transform_2(%arg0: i32) -> i32 {
    %c0_i32 = arith.constant 0 : i32
    %c0_i32_0 = arith.constant 0 : i32
    return %c0_i32 : i32
  }
  func.func @transform_3(%arg0: i32) -> i32 {
    %c0_i32 = arith.constant 0 : i32
    %c0_i32_0 = arith.constant 0 : i32
    return %c0_i32 : i32
  }
}

</mosaic_0001>

<bundles_post_ra>
// kernel: tpu_custom_call.1
= control target key start
LH: loop header
LB: loop body
LE: loop exit
PB: predicated region body
PF: predicated region fallthrough
CT: control target
= control target key end

     0   :  { %9 = vsyncpa [#allocation4], 0  ;;  %s309_s0 = inlined_call_operand.hbm [shape: f32[8,128], index: 0, kind: input, shape index: {}]   ;;  %s310_s1 = inlined_call_operand.hbm [shape: f32[8,128], index: 1, kind: input, shape index: {}]   ;;  %s311_s2 = inlined_call_operand.hbm [shape: f32[1], index: 2, kind: output, shape index: {0}]   ;;  %s312_s3 = inlined_call_operand.hbm [shape: f32[1], index: 3, kind: output, shape index: {1}]  }
   0x1   :  { %10 = vsyncpa [#allocation7], 0 }
   0x2   :  { %11 = vsyncpa [#allocation5], 0 }
   0x3   :  { %12 = vsyncpa [#allocation10], 0  ;;  %s18_s14 = sshll.u32 %s309_s0, 4  ;;  %s272_s15 = smov [#allocation3]   ;;  %s19_s14 = int_to_ptr.hbm [resolvable:$true] %s18_s14 }
   0x4   :  { %s20_s16 = sshll.u32 %s272_s15, 4  ;;  %s29_s19 = sshll.u32 %s310_s1, 4  ;;  %s21_s16 = int_to_ptr.vmem [resolvable:$true] %s20_s16  ;;  %s30_s19 = int_to_ptr.hbm [resolvable:$true] %s29_s19 }
   0x5   :  { %23 = dma.hbm_to_vmem [thread:$0]  %s19_s14, 128, %s21_s16, [#allocation4]  }
   0x6   :  { %s273_s20 = smov [#allocation6]  }
   0x7   :  { %s31_s21 = sshll.u32 %s273_s20, 4  ;;  %s32_s21 = int_to_ptr.vmem [resolvable:$true] %s31_s21 }
   0x8   :  { %34 = dma.hbm_to_vmem [thread:$0]  %s30_s19, 128, %s32_s21, [#allocation7]  }
   0x9   :  { %264 = dma.done.wait [#allocation4], 128  }
   0xa   :  { %265 = vsyncadd [#allocation4], 4294967168 }
   0xb   :  { %266 = dma.done.wait [#allocation7], 128  }
   0xc   :  { %267 = vsyncadd [#allocation7], 4294967168  ;;  %v53_v0 = vld [vmem:[#allocation3] sm:$0xff]  ;;  %v54_v1 = vld [vmem:[#allocation6] sm:$0xff]  ;;  %v274_v3 = vmov 0.0   ;;  %s143_s22 = sshll.u32 %s311_s2, 4  ;;  %s144_s22 = int_to_ptr.hbm [resolvable:$true] %s143_s22 }
   0xd   :  { %vm55_vm0 = vcmp.eq.f32.partialorder %v54_v1, 1.0  ;;  %v61_v2 = vsub.f32 1.0, %v53_v0  ;;  %vm56_vm1 = vcmp.eq.f32.partialorder %v54_v1, 0.0  ;;  %s275_s25 = smov [#allocation8]   ;;  %s152_s30 = sshll.u32 %s312_s3, 4  ;;  %s153_s30 = int_to_ptr.hbm [resolvable:$true] %s152_s30 }
   0xe   :  { %v170_v4 = vsel %vm56_vm1, 1.0, %v274_v3  ;;  %v169_v9 = vsel %vm55_vm0, 1.0, %v274_v3  ;;  %s276_s7 = smov [#allocation9]  }
   0xf   :  { %v62_v5 = vsel %vm55_vm0, %v53_v0, %v61_v2  ;;  %96 = vadd.xlane.f32.xlu1 %v170_v4 }
  0x10   :  { %v63_v6 = vadd.f32 1e-14, %v62_v5 }
  0x12   :  { %188 = vlog2.f32 %v63_v6 }
  0x18   :  { %v189_v7 = vpop.eup %188 }
  0x19   :  { %v65_v8 = vmul.f32 0.6931472, %v189_v7 }
  0x1b   :  { %v66_v10 = vsub.f32 0.0, %v65_v8 }
  0x1d   :  { %v68_v11 = vmul.f32 %v169_v9, %v66_v10  ;;  %v82_v12 = vmul.f32 %v170_v4, %v66_v10 }
  0x1f   :  { %69 = vadd.xlane.f32.xlu0 %v68_v11 }
  0x27   :  { %83 = vadd.xlane.f32.xlu0 %v82_v12 }
  0x82   :  { %v97_v13 = vpop.xlane.xlu1 %96 }
  0x83   :  { %v98_v15 = vrot.slane %v97_v13, 4 }
  0x85   :  { %v99_v18 = vadd.f32 %v98_v15, %v97_v13 }
  0x87   :  { %v100_v21 = vrot.slane %v99_v18, 2 }
  0x89   :  { %v101_v27 = vadd.f32 %v100_v21, %v99_v18 }
  0x8b   :  { %v102_v30 = vrot.slane %v101_v27, 1 }
  0x8d   :  { %v103_v33 = vadd.f32 %v102_v30, %v101_v27 }
  0x92   :  { %v70_v14 = vpop.xlane.xlu0 %69 }
  0x93   :  { %v71_v16 = vrot.slane %v70_v14, 4 }
  0x95   :  { %v72_v17 = vadd.f32 %v71_v16, %v70_v14 }
  0x97   :  { %v73_v19 = vrot.slane %v72_v17, 2 }
  0x99   :  { %v74_v20 = vadd.f32 %v73_v19, %v72_v17 }
  0x9a   :  { %v84_v22 = vpop.xlane.xlu0 %83 }
  0x9b   :  { %v85_v23 = vrot.slane %v84_v22, 4  ;;  %v75_v24 = vrot.slane %v74_v20, 1 }
  0x9d   :  { %v86_v25 = vadd.f32 %v85_v23, %v84_v22  ;;  %v76_v26 = vadd.f32 %v75_v24, %v74_v20 }
  0x9f   :  { %v87_v28 = vrot.slane %v86_v25, 2  ;;  %175 = vpush %v76_v26 }
  0xa1   :  { %v88_v29 = vadd.f32 %v87_v28, %v86_v25 }
  0xa3   :  { %v89_v31 = vrot.slane %v88_v29, 1 }
  0xa5   :  { %v90_v32 = vadd.f32 %v89_v31, %v88_v29 }
  0xa7   :  { %177 = vpush %v90_v32 }
  0xa8   :  { %179 = vpush %v103_v33 }
  0xd0   :  { %s176_s23 = spop %175 }
  0xd1   :  { %s112_s24 = smul.f32 0.125, %s176_s23 }
  0xd3   :  { %114 = sst [smem:[#allocation8]] %s112_s24 }
  0xd4   :  { %146 = dma.smem_to_hbm %s275_s25, 16, %s144_s22, [#allocation5]  }
  0xd8   :  { %s178_s26 = spop %177 }
  0xd9   :  { %s180_s27 = spop %179  ;;  %s116_s4 = smul.f32 0.125, %s178_s26 }
  0xda   :  { %s118_s28 = sfloor.f32 %s180_s27 }
  0xdb   :  { %v119_v34 = vstv %s118_s28 }
  0xdc   :  { %190 = vrcp.f32 %v119_v34  ;;  %v131_v38 = vand.u32 2147483648, %v119_v34  ;;  %v129_v40 = vand.u32 2147483647, %v119_v34  ;;  %vm125_vm3 = vweird.f32 %v119_v34 }
  0xde   :  { %v132_v42 = vor.u32 1.1754944e-38, %v131_v38  ;;  %vm130_vm5 = vcmp.eq.f32.partialorder %v129_v40, 8.507059e+37 }
  0xe2   :  { %v191_v35 = vpop.eup %190 }
  0xe3   :  { %v121_v36 = vmul.f32 %v191_v35, %v119_v34  ;;  %vm126_vm2 = vweird.f32 %v191_v35 }
  0xe4   :  { %vm127_vm4 = vmor %vm125_vm3, %vm126_vm2 }
  0xe5   :  { %v122_v37 = vsub.f32 1.0, %v121_v36 }
  0xe7   :  { %v123_v39 = vmul.f32 %v191_v35, %v122_v37 }
  0xe9   :  { %v124_v41 = vadd.f32 %v191_v35, %v123_v39 }
  0xeb   :  { %v128_v43 = vsel %vm127_vm4, %v191_v35, %v124_v41 }
  0xec   :  { %v133_v44 = vsel %vm130_vm5, %v132_v42, %v128_v43 }
  0xed   :  { %181 = vpush %v133_v44 }
 0x11e   :  { %s182_s5 = spop %181 }
 0x11f   :  { %s135_s6 = smul.f32 %s182_s5, %s116_s4 }
 0x121   :  { %137 = sst [smem:[#allocation9]] %s135_s6 }
 0x122   :  { %155 = dma.smem_to_hbm %s276_s7, 16, %s153_s30, [#allocation10]  }
 0x123   :  { %268 = dma.done.wait [#allocation5], 16  }
 0x124   :  { %269 = vsyncadd [#allocation5], 4294967280 }
 0x125   :  { %270 = dma.done.wait [#allocation10], 16  }
 0x126   :  { %271 = vsyncadd [#allocation10], 4294967280 }
 0x127   :  { %164 = sfence }
 0x128   :  { %165 = vsyncpa [#allocation4], 1 }
 0x129   :  { %166 = vsyncpa [#allocation7], 1 }
 0x12a   :  { %167 = vsyncpa [#allocation5], 1 }
 0x12b   :  { %168 = vsyncpa [#allocation10], 1 }

</bundles_post_ra>
